<compile_context>
chip_gen: v5e
topology: v5e:2x2
jax: 0.10.0
libtpu: 0.0.40
codegen_flags: <defaults>
</compile_context>

<pallas_src>
import functools

import jax
import jax.numpy as jnp
from jax.experimental import pallas as pl
from jax.experimental.pallas import tpu as pltpu


def _spatial_attention_kernel(x_ref, rc_ref, w_ref, o_ref, *, C, H, W, K):
    # x_ref:  VMEM (NB, C, HW)   NB batch elements, lane-dense flattened spatial axis
    # rc_ref: VMEM (2, HW) int32 row 0 = spatial row index, row 1 = spatial col index
    # w_ref:  SMEM (2*K*K,)      flattened conv weight (out=1, in=2, K, K), OIHW order
    # o_ref:  VMEM (NB, 1, HW)
    NB = x_ref.shape[0]
    HW = H * W
    P = K // 2
    inv_c = 1.0 / C

    row = rc_ref[0:1, :]                        # (1, HW) int32
    col = rc_ref[1:2, :]                        # (1, HW) int32

    for b in range(NB):                         # NB is small (<= 8), fully unrolled
        # ---- fused single-pass channel mean + max (each channel read once) ----
        x0 = x_ref[b, pl.ds(0, 1), :].astype(jnp.float32)        # (1, HW)
        acc_sum = x0
        acc_max = x0
        for c in range(1, C):
            xc = x_ref[b, pl.ds(c, 1), :].astype(jnp.float32)
            acc_sum = acc_sum + xc
            acc_max = jnp.maximum(acc_max, xc)
        avg = acc_sum * inv_c                   # (1, HW)

        # ---- KxK "same" conv (2 -> 1 channels, no bias) via rolled taps ----
        acc = jnp.zeros((1, HW), dtype=jnp.float32)
        for ky in range(K):
            dy = ky - P
            row_ok = (row >= -dy) & (row < H - dy)               # (1, HW) bool
            for kx in range(K):
                dx = kx - P
                w_a = w_ref[0 * K * K + ky * K + kx]             # avg-plane tap weight
                w_m = w_ref[1 * K * K + ky * K + kx]             # max-plane tap weight
                if dy == 0 and dx == 0:
                    acc = acc + (w_a * avg + w_m * acc_max)
                    continue
                shift = dy * W + dx              # want plane[i + shift] at output i
                amt = (-shift) % HW              # jnp.roll-style rotation amount
                r_avg = pltpu.roll(avg, shift=amt, axis=1)
                r_max = pltpu.roll(acc_max, shift=amt, axis=1)
                col_ok = (col >= -dx) & (col < W - dx)
                mask = row_ok & col_ok           # zero out padding / row-wrap taps
                tap = w_a * r_avg + w_m * r_max
                acc = acc + jnp.where(mask, tap, 0.0)

        o_ref[b] = jax.nn.sigmoid(acc).astype(o_ref.dtype)


def spatial_attention(x, weight, kernel=3):
    """x: (N, C, H, W); weight: (1, 2, kernel, kernel) float32."""
    N, C, H, W = x.shape
    K = kernel
    HW = H * W

    x_flat = x.reshape(N, C, HW)                      # lane-dense spatial axis (free reshape)
    w_flat = weight.reshape(-1).astype(jnp.float32)   # (2*K*K,) scalars for SMEM

    # Precomputed spatial (row, col) coordinates of every flattened position;
    # used in-kernel for the conv border masks (avoids vector int div/mod).
    rows = jnp.repeat(jnp.arange(H, dtype=jnp.int32), W)
    cols = jnp.tile(jnp.arange(W, dtype=jnp.int32), H)
    rc = jnp.stack([rows, cols], axis=0)              # (2, HW)

    # Batch block size: target ~2 MiB of input per grid step, keep the unrolled
    # per-element loop small, keep >= 2 grid steps when possible (v7x megacore),
    # and require NB | N.
    bytes_per_n = C * HW * x.dtype.itemsize
    nb = max(1, min(N, (1 << 21) // max(1, bytes_per_n)))
    nb = min(nb, 8)
    if N >= 2:
        nb = min(nb, N // 2)
    nb = max(nb, 1)
    while N % nb:
        nb -= 1

    kernel_fn = functools.partial(_spatial_attention_kernel, C=C, H=H, W=W, K=K)

    out = pl.pallas_call(
        kernel_fn,
        out_shape=jax.ShapeDtypeStruct((N, 1, HW), x.dtype),
        grid_spec=pltpu.PrefetchScalarGridSpec(
            num_scalar_prefetch=0,
            grid=(N // nb,),
            in_specs=[
                pl.BlockSpec((nb, C, HW), lambda n: (n, 0, 0)),
                pl.BlockSpec((2, HW), lambda n: (0, 0)),
                pl.BlockSpec(memory_space=pltpu.MemorySpace.SMEM),
            ],
            out_specs=pl.BlockSpec((nb, 1, HW), lambda n: (n, 0, 0)),
        ),
        compiler_params=pltpu.CompilerParams(
            dimension_semantics=("parallel",),
        ),
    )(x_flat, rc, w_flat)

    return out.reshape(N, 1, H, W)


def spatial_attention_ref(x, weight):
    """Pure-JAX reference (mirrors the PyTorch module)."""
    avg = jnp.mean(x, axis=1, keepdims=True)
    mx = jnp.max(x, axis=1, keepdims=True)
    cat = jnp.concatenate([avg, mx], axis=1)                  # (N,2,H,W)
    y = jax.lax.conv_general_dilated(
        cat, weight, window_strides=(1, 1), padding="SAME",
        dimension_numbers=("NCHW", "OIHW", "NCHW"),
    )
    return jax.nn.sigmoid(y)


if __name__ == "__main__":
    key = jax.random.PRNGKey(0)
    kx, kw = jax.random.split(key)

    N, C, H, W = 2, 4, 16, 16
    kernel = 3

    x = jax.random.normal(kx, (N, C, H, W), dtype=jnp.float32)

    # Deterministic Conv2d-style init: U(-b, b), b = 1/sqrt(fan_in), fan_in = 2*K*K.
    fan_in = 2 * kernel * kernel
    bound = 1.0 / (fan_in ** 0.5)
    weight = jax.random.uniform(
        kw, (1, 2, kernel, kernel), dtype=jnp.float32, minval=-bound, maxval=bound
    )

    out = spatial_attention(x, weight, kernel=kernel)
    out = jax.block_until_ready(out)

    ref = jax.block_until_ready(spatial_attention_ref(x, weight))
    assert out.shape == (N, 1, H, W), out.shape
    assert jnp.allclose(out, ref, atol=1e-5, rtol=1e-5), float(
        jnp.max(jnp.abs(out - ref))
    )

    print("KERNEL_OK")
</pallas_src>

<mosaic_0001>
module attributes {stable_mosaic.version = 11 : i64} {
  func.func @_spatial_attention_kernel(%arg0: i32, %arg1: memref<1x4x256xf32, #tpu.memory_space<vmem>>, %arg2: memref<2x256xi32, #tpu.memory_space<vmem>>, %arg3: memref<18xf32, #tpu.memory_space<smem>>, %arg4: memref<1x1x256xf32, #tpu.memory_space<vmem>>) attributes {dimension_semantics = [#tpu.dimension_semantics<parallel>], iteration_bounds = array<i64: 2>, scalar_prefetch = 0 : i64, scratch_operands = 0 : i64, tpu.core_type = #tpu.core_type<tc>, window_params = [{transform_indices = @transform_0, window_bounds = array<i64: 1, 4, 256>}, {pipeline_mode = #tpu.pipeline_mode<synchronous>, transform_indices = @transform_1, window_bounds = array<i64: 2, 256>}, {transform_indices = @transform_2, window_bounds = array<i64: 18>}, {transform_indices = @transform_3, window_bounds = array<i64: 1, 1, 256>}]} {
    %c0 = arith.constant 0 : index
    %c0_0 = arith.constant 0 : index
    %0 = vector.load %arg2[%c0, %c0_0] : memref<2x256xi32, #tpu.memory_space<vmem>>, vector<1x256xi32>
    %c1 = arith.constant 1 : index
    %c0_1 = arith.constant 0 : index
    %1 = vector.load %arg2[%c1, %c0_1] : memref<2x256xi32, #tpu.memory_space<vmem>>, vector<1x256xi32>
    %c0_2 = arith.constant 0 : index
    %c0_3 = arith.constant 0 : index
    %c0_4 = arith.constant 0 : index
    %2 = vector.load %arg1[%c0_2, %c0_3, %c0_4] : memref<1x4x256xf32, #tpu.memory_space<vmem>>, vector<1x1x256xf32>
    %3 = vector.shape_cast %2 : vector<1x1x256xf32> to vector<1x256xf32>
    %c0_5 = arith.constant 0 : index
    %c1_6 = arith.constant 1 : index
    %c0_7 = arith.constant 0 : index
    %4 = vector.load %arg1[%c0_5, %c1_6, %c0_7] : memref<1x4x256xf32, #tpu.memory_space<vmem>>, vector<1x1x256xf32>
    %5 = vector.shape_cast %4 : vector<1x1x256xf32> to vector<1x256xf32>
    %6 = arith.addf %3, %5 : vector<1x256xf32>
    %7 = arith.maximumf %3, %5 : vector<1x256xf32>
    %c0_8 = arith.constant 0 : index
    %c2 = arith.constant 2 : index
    %c0_9 = arith.constant 0 : index
    %8 = vector.load %arg1[%c0_8, %c2, %c0_9] : memref<1x4x256xf32, #tpu.memory_space<vmem>>, vector<1x1x256xf32>
    %9 = vector.shape_cast %8 : vector<1x1x256xf32> to vector<1x256xf32>
    %10 = arith.addf %6, %9 : vector<1x256xf32>
    %11 = arith.maximumf %7, %9 : vector<1x256xf32>
    %c0_10 = arith.constant 0 : index
    %c3 = arith.constant 3 : index
    %c0_11 = arith.constant 0 : index
    %12 = vector.load %arg1[%c0_10, %c3, %c0_11] : memref<1x4x256xf32, #tpu.memory_space<vmem>>, vector<1x1x256xf32>
    %13 = vector.shape_cast %12 : vector<1x1x256xf32> to vector<1x256xf32>
    %14 = arith.addf %10, %13 : vector<1x256xf32>
    %15 = arith.maximumf %11, %13 : vector<1x256xf32>
    %cst = arith.constant 2.500000e-01 : f32
    %16 = vector.broadcast %cst : f32 to vector<1x256xf32>
    %17 = arith.mulf %14, %16 : vector<1x256xf32>
    %cst_12 = arith.constant 0.000000e+00 : f32
    %18 = vector.broadcast %cst_12 : f32 to vector<1x256xf32>
    %c1_i32 = arith.constant 1 : i32
    %19 = vector.broadcast %c1_i32 : i32 to vector<1x256xi32>
    %20 = arith.cmpi sge, %0, %19 : vector<1x256xi32>
    %c17_i32 = arith.constant 17 : i32
    %21 = vector.broadcast %c17_i32 : i32 to vector<1x256xi32>
    %22 = arith.cmpi slt, %0, %21 : vector<1x256xi32>
    %23 = arith.andi %20, %22 : vector<1x256xi1>
    %c0_13 = arith.constant 0 : index
    %24 = memref.load %arg3[%c0_13] : memref<18xf32, #tpu.memory_space<smem>>
    %c9 = arith.constant 9 : index
    %25 = memref.load %arg3[%c9] : memref<18xf32, #tpu.memory_space<smem>>
    %c17_i32_14 = arith.constant 17 : i32
    %26 = tpu.dynamic_rotate %17 by %c17_i32_14 dim 1 : vector<1x256xf32>, i32 -> vector<1x256xf32>
    %c17_i32_15 = arith.constant 17 : i32
    %27 = tpu.dynamic_rotate %15 by %c17_i32_15 dim 1 : vector<1x256xf32>, i32 -> vector<1x256xf32>
    %c1_i32_16 = arith.constant 1 : i32
    %28 = vector.broadcast %c1_i32_16 : i32 to vector<1x256xi32>
    %29 = arith.cmpi sge, %1, %28 : vector<1x256xi32>
    %c17_i32_17 = arith.constant 17 : i32
    %30 = vector.broadcast %c17_i32_17 : i32 to vector<1x256xi32>
    %31 = arith.cmpi slt, %1, %30 : vector<1x256xi32>
    %32 = arith.andi %29, %31 : vector<1x256xi1>
    %33 = arith.andi %23, %32 : vector<1x256xi1>
    %34 = vector.broadcast %24 : f32 to vector<1x256xf32>
    %35 = arith.mulf %34, %26 : vector<1x256xf32>
    %36 = vector.broadcast %25 : f32 to vector<1x256xf32>
    %37 = arith.mulf %36, %27 : vector<1x256xf32>
    %38 = arith.addf %35, %37 : vector<1x256xf32>
    %cst_18 = arith.constant 0.000000e+00 : f32
    %39 = vector.broadcast %cst_18 : f32 to vector<1x256xf32>
    %40 = arith.select %33, %38, %39 : vector<1x256xi1>, vector<1x256xf32>
    %41 = arith.addf %18, %40 : vector<1x256xf32>
    %c1_19 = arith.constant 1 : index
    %42 = memref.load %arg3[%c1_19] : memref<18xf32, #tpu.memory_space<smem>>
    %c10 = arith.constant 10 : index
    %43 = memref.load %arg3[%c10] : memref<18xf32, #tpu.memory_space<smem>>
    %c16_i32 = arith.constant 16 : i32
    %44 = tpu.dynamic_rotate %17 by %c16_i32 dim 1 : vector<1x256xf32>, i32 -> vector<1x256xf32>
    %c16_i32_20 = arith.constant 16 : i32
    %45 = tpu.dynamic_rotate %15 by %c16_i32_20 dim 1 : vector<1x256xf32>, i32 -> vector<1x256xf32>
    %c0_i32 = arith.constant 0 : i32
    %46 = vector.broadcast %c0_i32 : i32 to vector<1x256xi32>
    %47 = arith.cmpi sge, %1, %46 : vector<1x256xi32>
    %c16_i32_21 = arith.constant 16 : i32
    %48 = vector.broadcast %c16_i32_21 : i32 to vector<1x256xi32>
    %49 = arith.cmpi slt, %1, %48 : vector<1x256xi32>
    %50 = arith.andi %47, %49 : vector<1x256xi1>
    %51 = arith.andi %23, %50 : vector<1x256xi1>
    %52 = vector.broadcast %42 : f32 to vector<1x256xf32>
    %53 = arith.mulf %52, %44 : vector<1x256xf32>
    %54 = vector.broadcast %43 : f32 to vector<1x256xf32>
    %55 = arith.mulf %54, %45 : vector<1x256xf32>
    %56 = arith.addf %53, %55 : vector<1x256xf32>
    %cst_22 = arith.constant 0.000000e+00 : f32
    %57 = vector.broadcast %cst_22 : f32 to vector<1x256xf32>
    %58 = arith.select %51, %56, %57 : vector<1x256xi1>, vector<1x256xf32>
    %59 = arith.addf %41, %58 : vector<1x256xf32>
    %c2_23 = arith.constant 2 : index
    %60 = memref.load %arg3[%c2_23] : memref<18xf32, #tpu.memory_space<smem>>
    %c11 = arith.constant 11 : index
    %61 = memref.load %arg3[%c11] : memref<18xf32, #tpu.memory_space<smem>>
    %c15_i32 = arith.constant 15 : i32
    %62 = tpu.dynamic_rotate %17 by %c15_i32 dim 1 : vector<1x256xf32>, i32 -> vector<1x256xf32>
    %c15_i32_24 = arith.constant 15 : i32
    %63 = tpu.dynamic_rotate %15 by %c15_i32_24 dim 1 : vector<1x256xf32>, i32 -> vector<1x256xf32>
    %c-1_i32 = arith.constant -1 : i32
    %64 = vector.broadcast %c-1_i32 : i32 to vector<1x256xi32>
    %65 = arith.cmpi sge, %1, %64 : vector<1x256xi32>
    %c15_i32_25 = arith.constant 15 : i32
    %66 = vector.broadcast %c15_i32_25 : i32 to vector<1x256xi32>
    %67 = arith.cmpi slt, %1, %66 : vector<1x256xi32>
    %68 = arith.andi %65, %67 : vector<1x256xi1>
    %69 = arith.andi %23, %68 : vector<1x256xi1>
    %70 = vector.broadcast %60 : f32 to vector<1x256xf32>
    %71 = arith.mulf %70, %62 : vector<1x256xf32>
    %72 = vector.broadcast %61 : f32 to vector<1x256xf32>
    %73 = arith.mulf %72, %63 : vector<1x256xf32>
    %74 = arith.addf %71, %73 : vector<1x256xf32>
    %cst_26 = arith.constant 0.000000e+00 : f32
    %75 = vector.broadcast %cst_26 : f32 to vector<1x256xf32>
    %76 = arith.select %69, %74, %75 : vector<1x256xi1>, vector<1x256xf32>
    %77 = arith.addf %59, %76 : vector<1x256xf32>
    %c0_i32_27 = arith.constant 0 : i32
    %78 = vector.broadcast %c0_i32_27 : i32 to vector<1x256xi32>
    %79 = arith.cmpi sge, %0, %78 : vector<1x256xi32>
    %c16_i32_28 = arith.constant 16 : i32
    %80 = vector.broadcast %c16_i32_28 : i32 to vector<1x256xi32>
    %81 = arith.cmpi slt, %0, %80 : vector<1x256xi32>
    %82 = arith.andi %79, %81 : vector<1x256xi1>
    %c3_29 = arith.constant 3 : index
    %83 = memref.load %arg3[%c3_29] : memref<18xf32, #tpu.memory_space<smem>>
    %c12 = arith.constant 12 : index
    %84 = memref.load %arg3[%c12] : memref<18xf32, #tpu.memory_space<smem>>
    %c1_i32_30 = arith.constant 1 : i32
    %85 = tpu.dynamic_rotate %17 by %c1_i32_30 dim 1 : vector<1x256xf32>, i32 -> vector<1x256xf32>
    %c1_i32_31 = arith.constant 1 : i32
    %86 = tpu.dynamic_rotate %15 by %c1_i32_31 dim 1 : vector<1x256xf32>, i32 -> vector<1x256xf32>
    %c1_i32_32 = arith.constant 1 : i32
    %87 = vector.broadcast %c1_i32_32 : i32 to vector<1x256xi32>
    %88 = arith.cmpi sge, %1, %87 : vector<1x256xi32>
    %c17_i32_33 = arith.constant 17 : i32
    %89 = vector.broadcast %c17_i32_33 : i32 to vector<1x256xi32>
    %90 = arith.cmpi slt, %1, %89 : vector<1x256xi32>
    %91 = arith.andi %88, %90 : vector<1x256xi1>
    %92 = arith.andi %82, %91 : vector<1x256xi1>
    %93 = vector.broadcast %83 : f32 to vector<1x256xf32>
    %94 = arith.mulf %93, %85 : vector<1x256xf32>
    %95 = vector.broadcast %84 : f32 to vector<1x256xf32>
    %96 = arith.mulf %95, %86 : vector<1x256xf32>
    %97 = arith.addf %94, %96 : vector<1x256xf32>
    %cst_34 = arith.constant 0.000000e+00 : f32
    %98 = vector.broadcast %cst_34 : f32 to vector<1x256xf32>
    %99 = arith.select %92, %97, %98 : vector<1x256xi1>, vector<1x256xf32>
    %100 = arith.addf %77, %99 : vector<1x256xf32>
    %c4 = arith.constant 4 : index
    %101 = memref.load %arg3[%c4] : memref<18xf32, #tpu.memory_space<smem>>
    %c13 = arith.constant 13 : index
    %102 = memref.load %arg3[%c13] : memref<18xf32, #tpu.memory_space<smem>>
    %103 = vector.broadcast %101 : f32 to vector<1x256xf32>
    %104 = arith.mulf %103, %17 : vector<1x256xf32>
    %105 = vector.broadcast %102 : f32 to vector<1x256xf32>
    %106 = arith.mulf %105, %15 : vector<1x256xf32>
    %107 = arith.addf %104, %106 : vector<1x256xf32>
    %108 = arith.addf %100, %107 : vector<1x256xf32>
    %c5 = arith.constant 5 : index
    %109 = memref.load %arg3[%c5] : memref<18xf32, #tpu.memory_space<smem>>
    %c14 = arith.constant 14 : index
    %110 = memref.load %arg3[%c14] : memref<18xf32, #tpu.memory_space<smem>>
    %c255_i32 = arith.constant 255 : i32
    %111 = tpu.dynamic_rotate %17 by %c255_i32 dim 1 : vector<1x256xf32>, i32 -> vector<1x256xf32>
    %c255_i32_35 = arith.constant 255 : i32
    %112 = tpu.dynamic_rotate %15 by %c255_i32_35 dim 1 : vector<1x256xf32>, i32 -> vector<1x256xf32>
    %c-1_i32_36 = arith.constant -1 : i32
    %113 = vector.broadcast %c-1_i32_36 : i32 to vector<1x256xi32>
    %114 = arith.cmpi sge, %1, %113 : vector<1x256xi32>
    %c15_i32_37 = arith.constant 15 : i32
    %115 = vector.broadcast %c15_i32_37 : i32 to vector<1x256xi32>
    %116 = arith.cmpi slt, %1, %115 : vector<1x256xi32>
    %117 = arith.andi %114, %116 : vector<1x256xi1>
    %118 = arith.andi %82, %117 : vector<1x256xi1>
    %119 = vector.broadcast %109 : f32 to vector<1x256xf32>
    %120 = arith.mulf %119, %111 : vector<1x256xf32>
    %121 = vector.broadcast %110 : f32 to vector<1x256xf32>
    %122 = arith.mulf %121, %112 : vector<1x256xf32>
    %123 = arith.addf %120, %122 : vector<1x256xf32>
    %cst_38 = arith.constant 0.000000e+00 : f32
    %124 = vector.broadcast %cst_38 : f32 to vector<1x256xf32>
    %125 = arith.select %118, %123, %124 : vector<1x256xi1>, vector<1x256xf32>
    %126 = arith.addf %108, %125 : vector<1x256xf32>
    %c-1_i32_39 = arith.constant -1 : i32
    %127 = vector.broadcast %c-1_i32_39 : i32 to vector<1x256xi32>
    %128 = arith.cmpi sge, %0, %127 : vector<1x256xi32>
    %c15_i32_40 = arith.constant 15 : i32
    %129 = vector.broadcast %c15_i32_40 : i32 to vector<1x256xi32>
    %130 = arith.cmpi slt, %0, %129 : vector<1x256xi32>
    %131 = arith.andi %128, %130 : vector<1x256xi1>
    %c6 = arith.constant 6 : index
    %132 = memref.load %arg3[%c6] : memref<18xf32, #tpu.memory_space<smem>>
    %c15 = arith.constant 15 : index
    %133 = memref.load %arg3[%c15] : memref<18xf32, #tpu.memory_space<smem>>
    %c241_i32 = arith.constant 241 : i32
    %134 = tpu.dynamic_rotate %17 by %c241_i32 dim 1 : vector<1x256xf32>, i32 -> vector<1x256xf32>
    %c241_i32_41 = arith.constant 241 : i32
    %135 = tpu.dynamic_rotate %15 by %c241_i32_41 dim 1 : vector<1x256xf32>, i32 -> vector<1x256xf32>
    %c1_i32_42 = arith.constant 1 : i32
    %136 = vector.broadcast %c1_i32_42 : i32 to vector<1x256xi32>
    %137 = arith.cmpi sge, %1, %136 : vector<1x256xi32>
    %c17_i32_43 = arith.constant 17 : i32
    %138 = vector.broadcast %c17_i32_43 : i32 to vector<1x256xi32>
    %139 = arith.cmpi slt, %1, %138 : vector<1x256xi32>
    %140 = arith.andi %137, %139 : vector<1x256xi1>
    %141 = arith.andi %131, %140 : vector<1x256xi1>
    %142 = vector.broadcast %132 : f32 to vector<1x256xf32>
    %143 = arith.mulf %142, %134 : vector<1x256xf32>
    %144 = vector.broadcast %133 : f32 to vector<1x256xf32>
    %145 = arith.mulf %144, %135 : vector<1x256xf32>
    %146 = arith.addf %143, %145 : vector<1x256xf32>
    %cst_44 = arith.constant 0.000000e+00 : f32
    %147 = vector.broadcast %cst_44 : f32 to vector<1x256xf32>
    %148 = arith.select %141, %146, %147 : vector<1x256xi1>, vector<1x256xf32>
    %149 = arith.addf %126, %148 : vector<1x256xf32>
    %c7 = arith.constant 7 : index
    %150 = memref.load %arg3[%c7] : memref<18xf32, #tpu.memory_space<smem>>
    %c16 = arith.constant 16 : index
    %151 = memref.load %arg3[%c16] : memref<18xf32, #tpu.memory_space<smem>>
    %c240_i32 = arith.constant 240 : i32
    %152 = tpu.dynamic_rotate %17 by %c240_i32 dim 1 : vector<1x256xf32>, i32 -> vector<1x256xf32>
    %c240_i32_45 = arith.constant 240 : i32
    %153 = tpu.dynamic_rotate %15 by %c240_i32_45 dim 1 : vector<1x256xf32>, i32 -> vector<1x256xf32>
    %c0_i32_46 = arith.constant 0 : i32
    %154 = vector.broadcast %c0_i32_46 : i32 to vector<1x256xi32>
    %155 = arith.cmpi sge, %1, %154 : vector<1x256xi32>
    %c16_i32_47 = arith.constant 16 : i32
    %156 = vector.broadcast %c16_i32_47 : i32 to vector<1x256xi32>
    %157 = arith.cmpi slt, %1, %156 : vector<1x256xi32>
    %158 = arith.andi %155, %157 : vector<1x256xi1>
    %159 = arith.andi %131, %158 : vector<1x256xi1>
    %160 = vector.broadcast %150 : f32 to vector<1x256xf32>
    %161 = arith.mulf %160, %152 : vector<1x256xf32>
    %162 = vector.broadcast %151 : f32 to vector<1x256xf32>
    %163 = arith.mulf %162, %153 : vector<1x256xf32>
    %164 = arith.addf %161, %163 : vector<1x256xf32>
    %cst_48 = arith.constant 0.000000e+00 : f32
    %165 = vector.broadcast %cst_48 : f32 to vector<1x256xf32>
    %166 = arith.select %159, %164, %165 : vector<1x256xi1>, vector<1x256xf32>
    %167 = arith.addf %149, %166 : vector<1x256xf32>
    %c8 = arith.constant 8 : index
    %168 = memref.load %arg3[%c8] : memref<18xf32, #tpu.memory_space<smem>>
    %c17 = arith.constant 17 : index
    %169 = memref.load %arg3[%c17] : memref<18xf32, #tpu.memory_space<smem>>
    %c239_i32 = arith.constant 239 : i32
    %170 = tpu.dynamic_rotate %17 by %c239_i32 dim 1 : vector<1x256xf32>, i32 -> vector<1x256xf32>
    %c239_i32_49 = arith.constant 239 : i32
    %171 = tpu.dynamic_rotate %15 by %c239_i32_49 dim 1 : vector<1x256xf32>, i32 -> vector<1x256xf32>
    %c-1_i32_50 = arith.constant -1 : i32
    %172 = vector.broadcast %c-1_i32_50 : i32 to vector<1x256xi32>
    %173 = arith.cmpi sge, %1, %172 : vector<1x256xi32>
    %c15_i32_51 = arith.constant 15 : i32
    %174 = vector.broadcast %c15_i32_51 : i32 to vector<1x256xi32>
    %175 = arith.cmpi slt, %1, %174 : vector<1x256xi32>
    %176 = arith.andi %173, %175 : vector<1x256xi1>
    %177 = arith.andi %131, %176 : vector<1x256xi1>
    %178 = vector.broadcast %168 : f32 to vector<1x256xf32>
    %179 = arith.mulf %178, %170 : vector<1x256xf32>
    %180 = vector.broadcast %169 : f32 to vector<1x256xf32>
    %181 = arith.mulf %180, %171 : vector<1x256xf32>
    %182 = arith.addf %179, %181 : vector<1x256xf32>
    %cst_52 = arith.constant 0.000000e+00 : f32
    %183 = vector.broadcast %cst_52 : f32 to vector<1x256xf32>
    %184 = arith.select %177, %182, %183 : vector<1x256xi1>, vector<1x256xf32>
    %185 = arith.addf %167, %184 : vector<1x256xf32>
    %186 = arith.negf %185 : vector<1x256xf32>
    %187 = math.exp %186 : vector<1x256xf32>
    %cst_53 = arith.constant 1.000000e+00 : f32
    %188 = vector.broadcast %cst_53 : f32 to vector<1x256xf32>
    %189 = arith.addf %188, %187 : vector<1x256xf32>
    %190 = arith.divf %188, %189 : vector<1x256xf32>
    %c0_54 = arith.constant 0 : index
    %c0_55 = arith.constant 0 : index
    %c0_56 = arith.constant 0 : index
    %191 = vector.load %arg4[%c0_54, %c0_55, %c0_56] : memref<1x1x256xf32, #tpu.memory_space<vmem>>, vector<1x1x256xf32>
    %192 = vector.shape_cast %191 : vector<1x1x256xf32> to vector<1x256xf32>
    %193 = vector.shape_cast %190 : vector<1x256xf32> to vector<1x1x256xf32>
    tpu.vector_store %arg4[%c0_54, %c0_55, %c0_56], %193 {strides = array<i32>} : memref<1x1x256xf32, #tpu.memory_space<vmem>>, vector<1x1x256xf32>,
    return
  }
  func.func @transform_0(%arg0: i32) -> (i32, i32, i32) {
    %c0_i32 = arith.constant 0 : i32
    %c0_i32_0 = arith.constant 0 : i32
    %c0_i32_1 = arith.constant 0 : i32
    return %arg0, %c0_i32, %c0_i32_0 : i32, i32, i32
  }
  func.func @transform_1(%arg0: i32) -> (i32, i32) {
    %c0_i32 = arith.constant 0 : i32
    %c0_i32_0 = arith.constant 0 : i32
    %c0_i32_1 = arith.constant 0 : i32
    return %c0_i32, %c0_i32_0 : i32, i32
  }
  func.func @transform_2(%arg0: i32) -> i32 {
    %c0_i32 = arith.constant 0 : i32
    %c0_i32_0 = arith.constant 0 : i32
    return %c0_i32 : i32
  }
  func.func @transform_3(%arg0: i32) -> (i32, i32, i32) {
    %c0_i32 = arith.constant 0 : i32
    %c0_i32_0 = arith.constant 0 : i32
    %c0_i32_1 = arith.constant 0 : i32
    return %arg0, %c0_i32, %c0_i32_0 : i32, i32, i32
  }
}

</mosaic_0001>

<bundles_post_ra>
// kernel: tpu_custom_call.1
= control target key start
LH: loop header
LB: loop body
LE: loop exit
PB: predicated region body
PF: predicated region fallthrough
CT: control target
= control target key end

     0   :  { %8 = vsyncpa [#allocation3], 0  ;;  %s1393_s0 = inlined_call_operand.hbm [shape: f32[2,4,256], index: 0, kind: input, shape index: {}]   ;;  %s1394_s1 = inlined_call_operand.hbm [shape: s32[2,256], index: 1, kind: input, shape index: {}]   ;;  %s1395_s2 = inlined_call_operand.vmem [shape: f32[18], index: 2, kind: input, shape index: {}]   ;;  %s1396_s3 = inlined_call_operand.hbm [shape: f32[2,1,256], index: 3, kind: output, shape index: {}]  }
   0x1   :  { %10 = vsyncpa [#allocation3 + $0x1], 0 }
   0x2   :  { %11 = vsyncpa [#allocation7], 0 }
   0x3   :  { %12 = vsyncpa [#allocation5], 0 }
   0x4   :  { %13 = vsyncpa [#allocation4], 0 }
   0x5   :  { %15 = vsyncpa [#allocation4 + $0x1], 0  ;;  %s953_s12 = smov 0   ;;  %s955_s13 = smov 0  }
   0x6   :  { %s957_s14 = smov 0   ;;  %s959_s15 = smov 0  }
   0x7 LB: > { %s974_s16 = sadd.s32 4294967295, %s921_s15   ;;  %s654_s17 = sadd.s32 4294967294, %s921_s15   ;;  %s921_s15 = sphi %s959_s15, %s1418_s15   ;;  %s917_s14 = sphi %s957_s14, %s1417_s14   ;;  %s913_s13 = sphi %s955_s13, %s1416_s13   ;;  %s909_s12 = sphi %s953_s12, %s1415_s12  }
   0x8   : > { %p41_p0 = scmp.ne.s32.totalorder %s913_s13, %s909_s12  ;;  %p42_p1 = scmp.eq.s32.totalorder %s974_s16, 0 }
   0x9   : > { %p107_p2 = scmp.eq.s32.totalorder %s974_s16, 1  ;;  %p113_p3 = scmp.eq.s32.totalorder %s654_s17, 1 }
   0xa   : > { %p983_p4 = por %p42_p1, %p41_p0  ;;  %p655_p5 = scmp.ge.s32.totalorder %s921_s15, 1 }
   0xb   : > { %p988_p6 = por %p113_p3, %p41_p0  ;;  %p120_p7 = scmp.lt.s32.totalorder %s921_s15, 3 }
   0xc   : > { %s132_s22 = sshll.u32 %s1394_s1, 4  ;;  %s923_s24 = smov [#allocation6]   ;;  %s133_s22 = int_to_ptr.hbm [resolvable:$true] %s132_s22 }
   0xd   : > { %p996_p8 = pnand %p655_p5, %p120_p7  ;;  %s134_s25 = sshll.u32 %s923_s24, 4  ;;  %s135_s25 = int_to_ptr.vmem [resolvable:$true] %s134_s25 }
   0xe   : > { %s144_s28 = sshll.u32 %s1395_s2, 4  ;;  %s924_s29 = smov [#allocation8]   ;;  %s145_s28 = int_to_ptr.vmem [resolvable:$true] %s144_s28 }
   0xf   : > { %p705_p10 = pneg %p996_p8  ;;  %s1009_s30 = sadd.s32 1, %s921_s15  }
  0x10   : > { %s28_s4 = sadd.s32 1, %s917_s14  ;;  %s25_s5 = ssub.s32 %s921_s15, %s1009_s30 }
  0x11   : > { %p706_p11 = pnand %p705_p10, %p42_p1  ;;  %p35_p12 = scmp.ne.s32.totalorder %s917_s14, %s913_s13 }
  0x12   : > { %p26_p13 = scmp.eq.s32.totalorder %s25_s5, 0  ;;  %p36_p0 = scmp.eq.s32.totalorder %s921_s15, 0 }
  0x13   : > { %708 = dma.hbm_to_vmem [thread:$0]  (!%p706_p11), %s133_s22, 64, %s135_s25, [#allocation7]  }
  0x14   : > { %711 = dma.vmem_to_smem (!%p706_p11), %s145_s28, 16, %s924_s29, [#allocation5]  }
  0x15   : > { %p1019_p3 = por %p107_p2, %p35_p12  ;;  %p722_p5 = scmp.lt.s32.totalorder %s921_s15, 2 }
  0x16   : > { %s1025_s7 = scalar_select %p26_p13, %s917_s14, %s28_s4  }
  0x17   : > { %p37_p7 = por %p36_p0, %p35_p12  ;;  %s155_s8 = sand.u32 1, %s917_s14  }
  0x18   : > { %s659_s9 = sshll.u32 %s155_s8, 3  ;;  %s692_s10 = sshll.u32 %s921_s15, 3 }
  0x19   : > { %s164_s20 = scalar_lea.hbm %s1393_s0, %s692_s10  ;;  %s159_s21 = scalar_lea.vmem [#allocation2], %s659_s9 }
  0x1a   : > { %s168_s22 = sshll.u32 %s159_s21, 4  ;;  %s166_s24 = sshll.u32 %s164_s20, 4  ;;  %s169_s22 = int_to_ptr.vmem [resolvable:$true] %s168_s22  ;;  %s167_s24 = int_to_ptr.hbm [resolvable:$true] %s166_s24 }
  0x1b   : > { %p1032_p2 = pnand %p722_p5, %p37_p7  ;;  %s156_s26 = scalar_lea.sflag [#allocation3], %s155_s8 }
  0x1c   : > { %s817_s27 = sshra.s32 %s167_s24, 4  ;;  %s824_s5 = scalar_lea.hbm %s1393_s0, 16  ;;  %s818_s27 = int_to_ptr.hbm [resolvable:$true] %s817_s27 }
  0x1d   : > { %s819_s28 = scalar_lea.hbm %s818_s27, 8  ;;  %p821_p11 = pneg %p1032_p2 }
  0x1e   : > { %p820_p10 = scmp.ne.s32.totalorder %s818_s27, %s819_s28  ;;  %p825_p0 = scmp.lt.s32.totalorder %s818_s27, %s1393_s0 }
  0x1f   : > { %p826_p5 = scmp.lt.s32.totalorder %s824_s5, %s819_s28 }
  0x20   : > { %p822_p12 = pnand %p821_p11, %p820_p10 }
  0x21   : > { %p827_p7 = por %p826_p5, %p825_p0 }
  0x22   : > { %p823_p13 = pneg %p822_p12 }
  0x24   : > { %p828_p9 = pnand %p827_p7, %p823_p13 }
  0x26   : > { %831 = shalt.err (!%p828_p9)
}
  0x27   : > { %715 = dma.hbm_to_vmem [thread:$0]  (!%p1032_p2), %s167_s24, 128, %s169_s22, %s156_s26  }
  0x28   : > { %177 = sbr.rel (%p996_p8) target bundleno = 300 (0x12c), region = 32  ;;  %s1049_s8 = sand.u32 (!%p996_p8), 1, %s913_s13  }
  0x29   : > { %s663_s11 = sshll.u32 (!%p996_p8), %s1049_s8, 3  ;;  %s180_s17 = scalar_lea.sflag (!%p996_p8), [#allocation3], %s1049_s8 }
  0x2a   : > { %s183_s20 = scalar_lea.vmem (!%p996_p8), [#allocation2], %s663_s11 }
  0x2d   : > { %892 = dma.done.wait (%p983_p4), %s180_s17, 128  }
  0x2e   : > { %894 = vsyncadd (%p983_p4), %s180_s17, 4294967168 }
  0x2f   : > { %896 = dma.done.wait (%p42_p1), [#allocation7], 64  }
  0x30   : > { %898 = vsyncadd (%p42_p1), [#allocation7], 4294967232 }
  0x31   : > { %900 = dma.done.wait (%p42_p1), [#allocation5], 16  }
  0x32   : > { %902 = vsyncadd (%p42_p1), [#allocation5], 4294967280 }
  0x33   : > { %199 = sfence }
  0x34   : > { %v221_v0 = vld [vmem:[%s183_s20] ss:$4 sm:$0x3]  ;;  %v667_v1 = vld [vmem:[%s183_s20 + $0x1] ss:$4 sm:$0x3]  ;;  %v249_v16 = vlaneseq }
  0x35   : > { %v225_v2 = vmax.f32 %v221_v0, %v667_v1  ;;  %v668_v3 = vld [vmem:[%s183_s20 + $0x2] ss:$4 sm:$0x3]  ;;  %v224_v4 = vadd.f32 %v667_v1, %v221_v0  ;;  %v669_v5 = vld [vmem:[%s183_s20 + $0x3] ss:$4 sm:$0x3] }
  0x36   : > { %s925_s18 = smov 17   ;;  %s926_s23 = smov 16   ;;  %v1076_v20 = vand.u32 127, %v249_v16  ;;  %vm280_vm1 = vcmask 1040384  }
  0x37   : > { %v229_v6 = vmax.f32 %v225_v2, %v668_v3  ;;  %v228_v7 = vadd.f32 %v668_v3, %v224_v4  ;;  %s927_s21 = smov 15   ;;  %s928_s22 = smov 1   ;;  %v1139_v0 = vld [vmem:[#allocation6] ss:$2 sm:$0x3] }
  0x38   : > { %s929_s24 = smov 127   ;;  %s930_s25 = smov 113   ;;  %vm251_vm0 = vcmp.lt.s32.totalorder %v1076_v20, 17  ;;  %vm291_vm2 = vcmp.lt.s32.totalorder %v1076_v20, 16  ;;  %vm325_vm3 = vcmp.lt.s32.totalorder %v1076_v20, 15  ;;  %vm362_vm6 = vcmp.lt.s32.totalorder %v1076_v20, 1 }
  0x39   : > { %v1065_v8 = vmax.f32 %v229_v6, %v669_v5  ;;  %v232_v9 = vadd.f32 %v669_v5, %v228_v7  ;;  %s931_s26 = smov 112   ;;  %s932_s27 = smov 111   ;;  %v220_v1 = vld [vmem:[#allocation6 + $0x1] ss:$2 sm:$0x3]  ;;  %vm235_vm7 = vcmp.ge.s32.totalorder %v1139_v0, 1 }
  0x3a   : > { %s670_s28 = sld [smem:[#allocation8 + $0x9]]  ;;  %vm300_vm4 = vcmp.ge.s32.totalorder %v220_v1, 0  ;;  %vm301_vm5 = vcmp.lt.s32.totalorder %v220_v1, 16  ;;  %vm236_vm8 = vcmp.lt.s32.totalorder %v1139_v0, 17  ;;  %vm265_vm9 = vcmp.ge.s32.totalorder %v220_v1, 1 }
  0x3b   : > { %v255_v10 = vperm.slane %v1065_v8, 0  ;;  %v1068_v11 = vmul.f32 0.25, %v232_v9  ;;  %v256_v13 = vperm.slane %v1065_v8, 1  ;;  %s238_s29 = sld [smem:[#allocation8]]  ;;  %vm266_vm10 = vcmp.lt.s32.totalorder %v220_v1, 17  ;;  %vm1170_vm11 = vmand %vm300_vm4, %vm301_vm5 }
  0x3c   : > { %s1092_s4 = sld [smem:[#allocation8 + $0xa]]  ;;  %vm334_vm12 = vcmp.ge.s32.totalorder %v220_v1, 4294967295  ;;  %vm335_vm13 = vcmp.lt.s32.totalorder %v220_v1, 15  ;;  %vm1183_vm14 = vmand %vm235_vm7, %vm236_vm8  ;;  %vm401_vm15 = vcmp.lt.s32.totalorder %v1076_v20, 127  ;;  %vm354_vm4 = vcmp.lt.s32.totalorder %v1139_v0, 16 }
  0x3d   : > { %259 = vrot.lane.b32.xlu1 %v255_v10, %s925_s18  ;;  %v241_v12 = vperm.slane %v1068_v11, 0  ;;  %v242_v14 = vperm.slane %v1068_v11, 1  ;;  %s1096_s5 = sld [smem:[#allocation8 + $0x1]]  ;;  %vm1213_vm5 = vmand %vm334_vm12, %vm335_vm13  ;;  %vm426_vm13 = vcmp.ge.s32.totalorder %v1139_v0, 4294967295 }
  0x3e   : > { %s1100_s9 = sld [smem:[#allocation8 + $0xb]]  ;;  %vm337_vm8 = vmand %vm1183_vm14, %vm1213_vm5 }
  0x3f   : > { %245 = vrot.lane.b32.xlu0 %v241_v12, %s925_s18  ;;  %287 = vrot.lane.b32.xlu2 %v241_v12, %s926_s23  ;;  %s1102_s10 = sld [smem:[#allocation8 + $0x2]] }
  0x40   : > { %v272_v23 = vstv %s670_s28  ;;  %s1108_s11 = sld [smem:[#allocation8 + $0xc]] }
  0x41   : > { %v269_v26 = vstv %s238_s29  ;;  %s1119_s17 = sld [smem:[#allocation8 + $0x3]]  ;;  %s666_s29 = sshll.u32 %s1049_s8, 1 }
  0x42   : > { %v307_v49 = vstv %s1092_s4  ;;  %s1124_s20 = sld [smem:[#allocation8 + $0x5]]  ;;  %s689_s4 = sshll.u32 %s974_s16, 1 }
  0x43   : > { %v304_v53 = vstv %s1096_s5  ;;  %s1304_s28 = sld [smem:[#allocation8 + $0x11]]  ;;  %s547_s16 = scalar_lea.sflag [#allocation4], %s1049_s8 }
  0x44   : > { %v341_v58 = vstv %s1100_s9 }
  0x45   : > { %261 = vrot.lane.b32.xlu1 %v256_v13, %s925_s18  ;;  %v338_v61 = vstv %s1102_s10  ;;  %s557_s10 = scalar_lea.hbm %s1396_s3, %s689_s4 }
  0x46   : > { %v375_v3 = vstv %s1108_s11  ;;  %s217_s11 = scalar_lea.vmem [#allocation9], %s666_s29 }
  0x47   : > { %247 = vrot.lane.b32.xlu0 %v242_v14, %s925_s18  ;;  %289 = vrot.lane.b32.xlu2 %v242_v14, %s926_s23  ;;  %s1134_s18 = sld [smem:[#allocation8 + $0x4]] }
  0x4d   : > { %296 = vrot.lane.b32.xlu1 %v256_v13, %s926_s23 }
  0x4f   : > { %294 = vrot.lane.b32.xlu0 %v255_v10, %s926_s23  ;;  %321 = vrot.lane.b32.xlu2 %v241_v12, %s927_s21  ;;  %s1143_s23 = sld [smem:[#allocation8 + $0xd]] }
  0x55   : > { %328 = vrot.lane.b32.xlu1 %v255_v10, %s927_s21 }
  0x57   : > { %323 = vrot.lane.b32.xlu0 %v242_v14, %s927_s21  ;;  %330 = vrot.lane.b32.xlu2 %v256_v13, %s927_s21  ;;  %s1149_s21 = sld [smem:[#allocation8 + $0xe]] }
  0x5d   : > { %360 = vrot.lane.b32.xlu1 %v242_v14, %s928_s22 }
  0x5f   : > { %358 = vrot.lane.b32.xlu0 %v241_v12, %s928_s22  ;;  %365 = vrot.lane.b32.xlu2 %v255_v10, %s928_s22 }
  0x65   : > { %397 = vrot.lane.b32.xlu1 %v241_v12, %s929_s24 }
  0x67   : > { %367 = vrot.lane.b32.xlu0 %v256_v13, %s928_s22  ;;  %399 = vrot.lane.b32.xlu2 %v242_v14, %s929_s24  ;;  %s1155_s22 = sld [smem:[#allocation8 + $0xf]] }
  0x6d   : > { %406 = vrot.lane.b32.xlu1 %v256_v13, %s929_s24 }
  0x6f   : > { %404 = vrot.lane.b32.xlu0 %v255_v10, %s929_s24  ;;  %431 = vrot.lane.b32.xlu2 %v241_v12, %s930_s25  ;;  %s1164_s24 = sld [smem:[#allocation8 + $0x6]] }
  0x75   : > { %438 = vrot.lane.b32.xlu1 %v255_v10, %s930_s25 }
  0x77   : > { %433 = vrot.lane.b32.xlu0 %v242_v14, %s930_s25  ;;  %440 = vrot.lane.b32.xlu2 %v256_v13, %s930_s25  ;;  %s1223_s25 = sld [smem:[#allocation8 + $0x7]] }
  0x7d   : > { %464 = vrot.lane.b32.xlu1 %v242_v14, %s931_s26 }
  0x7f   : > { %462 = vrot.lane.b32.xlu0 %v241_v12, %s931_s26  ;;  %469 = vrot.lane.b32.xlu2 %v255_v10, %s931_s26 }
  0x85   : > { %493 = vrot.lane.b32.xlu1 %v241_v12, %s932_s27 }
  0x87   : > { %471 = vrot.lane.b32.xlu0 %v256_v13, %s931_s26  ;;  %495 = vrot.lane.b32.xlu2 %v242_v14, %s932_s27  ;;  %s1232_s26 = sld [smem:[#allocation8 + $0x10]] }
  0x8d   : > { %502 = vrot.lane.b32.xlu1 %v256_v13, %s932_s27  ;;  %v372_v13 = vstv %s1119_s17  ;;  %s559_s17 = sshll.u32 %s217_s11, 4  ;;  %s560_s17 = int_to_ptr.vmem [resolvable:$true] %s559_s17 }
  0x8f   : > { %500 = vrot.lane.b32.xlu0 %v255_v10, %s932_s27  ;;  %s1291_s27 = sld [smem:[#allocation8 + $0x8]] }
  0x99   : > { %v1073_v15 = vpop.permute.xlu2 %287 }
  0xa1   : > { %v290_v17 = vpop.permute.xlu2 %289 }
  0xa2   : > { %v292_v54 = vsel %vm291_vm2, %v1073_v15, %v290_v17  ;;  %v293_v63 = vsel %vm291_vm2, %v290_v17, %v1073_v15 }
  0xa3   : > { %v306_v57 = vmul.f32 %v304_v53, %v292_v54  ;;  %v305_v10 = vmul.f32 %v304_v53, %v293_v63  ;;  %v445_v53 = vstv %s1164_s24  ;;  %s867_s24 = scalar_lea.hbm %s1396_s3, 4 }
  0xa9   : > { %v1079_v22 = vpop.permute.xlu2 %321 }
  0xaf   : > { %v260_v18 = vpop.permute.xlu1 %259 }
  0xb1   : > { %v246_v19 = vpop.permute.xlu0 %245  ;;  %v331_v40 = vpop.permute.xlu2 %330 }
  0xb7   : > { %v262_v21 = vpop.permute.xlu1 %261 }
  0xb8   : > { %v263_v24 = vsel %vm251_vm0, %v260_v18, %v262_v21  ;;  %v264_v25 = vsel %vm251_vm0, %v262_v21, %v260_v18 }
  0xb9   : > { %v248_v27 = vpop.permute.xlu0 %247  ;;  %v273_v30 = vmul.f32 %v272_v23, %v264_v25  ;;  %v274_v31 = vmul.f32 %v272_v23, %v263_v24  ;;  %v1084_v43 = vpop.permute.xlu2 %365 }
  0xba   : > { %v252_v28 = vsel %vm251_vm0, %v246_v19, %v248_v27  ;;  %v253_v29 = vsel %vm251_vm0, %v248_v27, %v246_v19  ;;  %vm353_vm0 = vcmp.ge.s32.totalorder %v1139_v0, 0 }
  0xbb   : > { %v270_v32 = vmul.f32 %v269_v26, %v253_v29  ;;  %v271_v33 = vmul.f32 %v269_v26, %v252_v28  ;;  %v411_v28 = vstv %s1124_s20  ;;  %s561_s20 = sshll.u32 %s557_s10, 4  ;;  %s562_s20 = int_to_ptr.hbm [resolvable:$true] %s561_s20 }
  0xbd   : > { %v275_v34 = vadd.f32 %v273_v30, %v270_v32  ;;  %v276_v35 = vadd.f32 %v274_v31, %v271_v33 }
  0xbf   : > { %v279_v36 = vrot.slane %v276_v35, 7  ;;  %v297_v37 = vpop.permute.xlu1 %296  ;;  %v389_v35 = vstv %s1134_s18  ;;  %s861_s18 = sshra.s32 %s562_s20, 4  ;;  %s862_s18 = int_to_ptr.hbm [resolvable:$true] %s861_s18 }
  0xc0   : > { %p868_p9 = scmp.lt.s32.totalorder %s862_s18, %s1396_s3 }
  0xc1   : > { %v1082_v38 = vsel %vm280_vm1, %v275_v34, %v279_v36  ;;  %v295_v39 = vpop.permute.xlu0 %294  ;;  %v1090_v46 = vpop.permute.xlu2 %399 }
  0xc2   : > { %v298_v50 = vsel %vm291_vm2, %v295_v39, %v297_v37  ;;  %v299_v59 = vsel %vm291_vm2, %v297_v37, %v295_v39  ;;  %vm303_vm2 = vmand %vm1183_vm14, %vm1170_vm11  ;;  %v414_v39 = vstv %s1149_s21 }
  0xc3   : > { %v309_v55 = vmul.f32 %v307_v49, %v298_v50  ;;  %v308_v4 = vmul.f32 %v307_v49, %v299_v59 }
  0xc5   : > { %v311_v2 = vadd.f32 %v309_v55, %v306_v57  ;;  %v310_v24 = vadd.f32 %v308_v4, %v305_v10 }
  0xc7   : > { %v329_v41 = vpop.permute.xlu1 %328  ;;  %v314_v12 = vrot.slane %v311_v2, 7 }
  0xc8   : > { %v332_v60 = vsel %vm325_vm3, %v329_v41, %v331_v40  ;;  %v333_v19 = vsel %vm325_vm3, %v331_v40, %v329_v41 }
  0xc9   : > { %v324_v42 = vpop.permute.xlu0 %323  ;;  %v1112_v52 = vpop.permute.xlu2 %431  ;;  %v343_v5 = vmul.f32 %v341_v58, %v332_v60  ;;  %v342_v29 = vmul.f32 %v341_v58, %v333_v19 }
  0xca   : > { %v326_v62 = vsel %vm325_vm3, %v1079_v22, %v324_v42  ;;  %v327_v21 = vsel %vm325_vm3, %v324_v42, %v1079_v22  ;;  %v315_v22 = vsel %vm280_vm1, %v310_v24, %v314_v12  ;;  %vm1201_vm3 = vmand %vm265_vm9, %vm266_vm10  ;;  %vm466_vm10 = vcmp.lt.s32.totalorder %v1076_v20, 112 }
  0xcb   : > { %v340_v6 = vmul.f32 %v338_v61, %v326_v62  ;;  %v339_v30 = vmul.f32 %v338_v61, %v327_v21  ;;  %v317_v42 = vsel %vm303_vm2, %v315_v22, 0.0  ;;  %vm268_vm7 = vmand %vm1183_vm14, %vm1201_vm3  ;;  %v390_v62 = vmul.f32 %v389_v35, %v1068_v11 }
  0xcc   : > { %vm1260_vm9 = vmand %vm353_vm0, %vm354_vm4  ;;  %v283_v1 = vsel %vm268_vm7, %v1082_v38, 0.0  ;;  %vm427_vm14 = vcmp.lt.s32.totalorder %v1139_v0, 15  ;;  %v510_v0 = vstv %s1304_s28  ;;  %vm543_vm7 = vcmp.lt.s32.totalorder %v249_v16, 256 }
  0xcd   : > { %v345_v25 = vadd.f32 %v343_v5, %v340_v6  ;;  %v318_v5 = vadd.f32 %v317_v42, %v283_v1  ;;  %vm371_vm12 = vmand %vm1260_vm9, %vm1201_vm3 }
  0xce   : > { %vm1324_vm0 = vmand %vm426_vm13, %vm427_vm14 }
  0xcf   : > { %v1086_v44 = vpop.permute.xlu1 %360  ;;  %v348_v37 = vrot.slane %v345_v25, 7  ;;  %vm410_vm2 = vmand %vm1260_vm9, %vm1213_vm5 }
  0xd0   : > { %vm444_vm4 = vmand %vm1324_vm0, %vm1201_vm3 }
  0xd1   : > { %v1088_v45 = vpop.permute.xlu0 %358  ;;  %v1162_v15 = vpop.permute.xlu2 %440  ;;  %vm475_vm3 = vmand %vm1324_vm0, %vm1170_vm11 }
  0xd2   : > { %v363_v14 = vsel %vm362_vm6, %v1088_v45, %v1086_v44  ;;  %v364_v33 = vsel %vm362_vm6, %v1086_v44, %v1088_v45  ;;  %v391_v44 = vstv %s1143_s23  ;;  %v448_v45 = vstv %s1155_s22  ;;  %s863_s23 = scalar_lea.hbm %s862_s18, 2 }
  0xd3   : > { %v374_v27 = vmul.f32 %v372_v13, %v363_v14  ;;  %v373_v49 = vmul.f32 %v372_v13, %v364_v33  ;;  %v392_v4 = vmul.f32 %v391_v44, %v1065_v8  ;;  %v476_v13 = vstv %s1223_s25  ;;  %p864_p1 = scmp.ne.s32.totalorder %s862_s18, %s863_s23  ;;  %p869_p2 = scmp.lt.s32.totalorder %s867_s24, %s863_s23 }
  0xd5   : > { %p865_p4 = pnand %p864_p1, %p1019_p3  ;;  %p870_p10 = por %p869_p2, %p868_p9 }
  0xd7   : > { %v1094_v47 = vpop.permute.xlu1 %397  ;;  %p866_p8 = pneg %p865_p4 }
  0xd8   : > { %v403_v50 = vsel %vm401_vm15, %v1090_v46, %v1094_v47  ;;  %v402_v12 = vsel %vm401_vm15, %v1094_v47, %v1090_v46  ;;  %v479_v47 = vstv %s1232_s26 }
  0xd9   : > { %v1098_v48 = vpop.permute.xlu0 %367  ;;  %v470_v63 = vpop.permute.xlu2 %469  ;;  %v413_v2 = vmul.f32 %v411_v28, %v403_v50  ;;  %v412_v24 = vmul.f32 %v411_v28, %v402_v12  ;;  %p871_p11 = pnand %p870_p10, %p866_p8 }
  0xda   : > { %v369_v7 = vsel %vm362_vm6, %v1084_v43, %v1098_v48  ;;  %v370_v31 = vsel %vm362_vm6, %v1098_v48, %v1084_v43  ;;  %vm435_vm6 = vcmp.lt.s32.totalorder %v1076_v20, 113  ;;  %v344_v48 = vadd.f32 %v342_v29, %v339_v30 }
  0xdb   : > { %v377_v23 = vmul.f32 %v375_v3, %v369_v7  ;;  %v376_v43 = vmul.f32 %v375_v3, %v370_v31  ;;  %v393_v31 = vadd.f32 %v392_v4, %v390_v62 }
  0xdc   : > { %v349_v60 = vsel %vm280_vm1, %v344_v48, %v348_v37  ;;  %v507_v48 = vstv %s1291_s27 }
  0xdd   : > { %v379_v34 = vadd.f32 %v377_v23, %v374_v27  ;;  %v378_v3 = vadd.f32 %v376_v43, %v373_v49  ;;  %v351_v11 = vsel %vm337_vm8, %v349_v60, 0.0 }
  0xde   : > { %v352_v19 = vadd.f32 %v351_v11, %v318_v5 }
  0xdf   : > { %v1110_v51 = vpop.permute.xlu1 %406  ;;  %v382_v55 = vrot.slane %v379_v34, 7 }
  0xe1   : > { %v1121_v56 = vpop.permute.xlu0 %404  ;;  %v383_v38 = vsel %vm280_vm1, %v378_v3, %v382_v55  ;;  %v496_v35 = vpop.permute.xlu2 %495 }
  0xe2   : > { %v409_v40 = vsel %vm401_vm15, %v1110_v51, %v1121_v56  ;;  %v408_v8 = vsel %vm401_vm15, %v1121_v56, %v1110_v51  ;;  %v385_v21 = vsel %vm371_vm12, %v383_v38, 0.0  ;;  %vm497_vm15 = vcmp.lt.s32.totalorder %v1076_v20, 111 }
  0xe3   : > { %v416_v57 = vmul.f32 %v414_v39, %v409_v40  ;;  %v415_v23 = vmul.f32 %v414_v39, %v408_v8  ;;  %v386_v30 = vadd.f32 %v385_v21, %v352_v19 }
  0xe5   : > { %v418_v10 = vadd.f32 %v416_v57, %v413_v2  ;;  %v417_v28 = vadd.f32 %v415_v23, %v412_v24  ;;  %v394_v50 = vadd.f32 %v393_v31, %v386_v30 }
  0xe7   : > { %v1151_v9 = vpop.permute.xlu1 %438  ;;  %v421_v25 = vrot.slane %v418_v10, 7 }
  0xe8   : > { %v443_v58 = vsel %vm435_vm6, %v1162_v15, %v1151_v9  ;;  %v442_v51 = vsel %vm435_vm6, %v1151_v9, %v1162_v15 }
  0xe9   : > { %v1166_v17 = vpop.permute.xlu0 %433  ;;  %v450_v6 = vmul.f32 %v448_v45, %v443_v58  ;;  %v449_v26 = vmul.f32 %v448_v45, %v442_v51 }
  0xea   : > { %v437_v59 = vsel %vm435_vm6, %v1166_v17, %v1112_v52  ;;  %v436_v56 = vsel %vm435_vm6, %v1112_v52, %v1166_v17  ;;  %vm506_vm6 = vmand %vm1324_vm0, %vm1213_vm5 }
  0xeb   : > { %v447_v7 = vmul.f32 %v445_v53, %v437_v59  ;;  %v446_v27 = vmul.f32 %v445_v53, %v436_v56 }
  0xed   : > { %v452_v9 = vadd.f32 %v450_v6, %v447_v7  ;;  %v451_v42 = vadd.f32 %v449_v26, %v446_v27 }
  0xef   : > { %v465_v41 = vpop.permute.xlu1 %464  ;;  %v455_v34 = vrot.slane %v452_v9, 7 }
  0xf1   : > { %v463_v54 = vpop.permute.xlu0 %462  ;;  %v456_v53 = vsel %vm280_vm1, %v451_v42, %v455_v34 }
  0xf2   : > { %v468_v46 = vsel %vm466_vm10, %v465_v41, %v463_v54  ;;  %v467_v33 = vsel %vm466_vm10, %v463_v54, %v465_v41  ;;  %v422_v41 = vsel %vm280_vm1, %v417_v28, %v421_v25  ;;  %v458_v1 = vsel %vm444_vm4, %v456_v53, 0.0 }
  0xf3   : > { %v478_v22 = vmul.f32 %v476_v13, %v468_v46  ;;  %v477_v43 = vmul.f32 %v476_v13, %v467_v33  ;;  %v424_v57 = vsel %vm410_vm2, %v422_v41, 0.0 }
  0xf4   : > { %v425_v2 = vadd.f32 %v424_v57, %v394_v50 }
  0xf6   : > { %v459_v6 = vadd.f32 %v458_v1, %v425_v2 }
  0xf7   : > { %v494_v14 = vpop.permute.xlu1 %493 }
  0xf8   : > { %v499_v49 = vsel %vm497_vm15, %v496_v35, %v494_v14  ;;  %v498_v58 = vsel %vm497_vm15, %v494_v14, %v496_v35 }
  0xf9   : > { %v472_v15 = vpop.permute.xlu0 %471  ;;  %v509_v61 = vmul.f32 %v507_v48, %v499_v49  ;;  %v508_v3 = vmul.f32 %v507_v48, %v498_v58 }
  0xfa   : > { %v473_v52 = vsel %vm466_vm10, %v470_v63, %v472_v15  ;;  %v474_v17 = vsel %vm466_vm10, %v472_v15, %v470_v63 }
  0xfb   : > { %v481_v29 = vmul.f32 %v479_v47, %v474_v17  ;;  %v480_v37 = vmul.f32 %v479_v47, %v473_v52 }
  0xfd   : > { %v483_v39 = vadd.f32 %v481_v29, %v478_v22  ;;  %v482_v54 = vadd.f32 %v480_v37, %v477_v43 }
  0xff   : > { %v486_v44 = vrot.slane %v483_v39, 7  ;;  %v503_v45 = vpop.permute.xlu1 %502 }
 0x101   : > { %v501_v55 = vpop.permute.xlu0 %500  ;;  %v487_v32 = vsel %vm280_vm1, %v482_v54, %v486_v44 }
 0x102   : > { %v504_v59 = vsel %vm497_vm15, %v501_v55, %v503_v45  ;;  %v505_v60 = vsel %vm497_vm15, %v503_v45, %v501_v55  ;;  %v489_v5 = vsel %vm475_vm3, %v487_v32, 0.0 }
 0x103   : > { %v511_v62 = vmul.f32 %v510_v0, %v504_v59  ;;  %v512_v63 = vmul.f32 %v510_v0, %v505_v60  ;;  %v490_v7 = vadd.f32 %v489_v5, %v459_v6 }
 0x105   : > { %v514_v4 = vadd.f32 %v512_v63, %v509_v61  ;;  %v513_v20 = vadd.f32 %v511_v62, %v508_v3 }
 0x107   : > { %v517_v18 = vrot.slane %v514_v4, 7 }
 0x109   : > { %v518_v11 = vsel %vm280_vm1, %v513_v20, %v517_v18 }
 0x10a   : > { %v520_v38 = vsel %vm506_vm6, %v518_v11, 0.0 }
 0x10b   : > { %v521_v8 = vadd.f32 %v520_v38, %v490_v7 }
 0x10d   : > { %v687_v10 = vmul.f32 -1.442695, %v521_v8 }
 0x10f   : > { %768 = vpow2.f32 %v687_v10 }
 0x115   : > { %v769_v12 = vpop.eup %768 }
 0x116   : > { %v525_v13 = vadd.f32 1.0, %v769_v12 }
 0x118   : > { %770 = vrcp.f32 %v525_v13  ;;  %v537_v56 = vand.u32 2147483648, %v525_v13  ;;  %v535_v47 = vand.u32 2147483647, %v525_v13  ;;  %vm531_vm1 = vweird.f32 %v525_v13 }
 0x11a   : > { %v538_v21 = vor.u32 1.1754944e-38, %v537_v56  ;;  %vm536_vm8 = vcmp.eq.f32.partialorder %v535_v47, 8.507059e+37 }
 0x11e   : > { %v771_v14 = vpop.eup %770 }
 0x11f   : > { %v527_v51 = vmul.f32 %v771_v14, %v525_v13  ;;  %vm532_vm11 = vweird.f32 %v771_v14 }
 0x120   : > { %vm533_vm5 = vmor %vm531_vm1, %vm532_vm11 }
 0x121   : > { %v528_v36 = vsub.f32 1.0, %v527_v51 }
 0x123   : > { %v529_v46 = vmul.f32 %v771_v14, %v528_v36 }
 0x125   : > { %v530_v19 = vadd.f32 %v771_v14, %v529_v46 }
 0x127   : > { %v534_v23 = vsel %vm533_vm5, %v771_v14, %v530_v19 }
 0x128   : > { %v539_v9 = vsel %vm536_vm8, %v538_v21, %v534_v23 }
 0x129   : > { %545 = vst.msk [vmem:[%s217_s11] sm:$0x3] %vm543_vm7, %v539_v9 }
 0x12a   : > { %874 = shalt.err (!%p871_p11)
}
 0x12b   : > { %703 = dma.vmem_to_hbm [thread:$0]  (%p1019_p3), %s560_s17, 32, %s562_s20, %s547_s16  }
 0x12c PF: > { %s573_s8 = sand.u32 1, %s909_s12   ;;  %p1414_p12 = scmp.ge.s32.totalorder %s921_s15, 2 }
 0x12d   : > { %s574_s27 = scalar_lea.sflag [#allocation4], %s573_s8 }
 0x12e   : > { %p717_p13 = pnand %p1414_p12, %p988_p6 }
 0x130   : > { %p718_p0 = pneg %p717_p13 }
 0x132   : > { %904 = dma.done.wait (%p718_p0), %s574_s27, 32  }
 0x133   : > { %906 = vsyncadd (%p718_p0), %s574_s27, 4294967264  ;;  %p18_p5 = scmp.ge.s32.totalorder %s1009_s30, 4   ;;  %s1415_s12 = smov %s913_s13 }
 0x134   : > { %s1416_s13 = smov %s917_s14  ;;  %s1417_s14 = smov %s1025_s7 }
 0x135   : > { %s1418_s15 = smov %s1009_s30  ;;  %20 = sbr.rel (!%p18_p5) target bundleno = 7 (0x7), region = 90 }
 0x13a   :  { %580 = vsyncpa [#allocation3], 1 }
 0x13b   :  { %582 = vsyncpa [#allocation3 + $0x1], 1 }
 0x13c   :  { %583 = vsyncpa [#allocation7], 1 }
 0x13d   :  { %584 = vsyncpa [#allocation4], 1 }
 0x13e   :  { %586 = vsyncpa [#allocation4 + $0x1], 1 }
 0x13f   :  { %587 = vsyncpa [#allocation5], 1 }
 0x140   :  { %589 = vsyncpa [#allocation5 + $0x1], 1 }

</bundles_post_ra>
